<compile_context>
chip_gen: v6e
topology: v6e:2x2x1
jax: 0.10.0
libtpu: 0.0.40
codegen_flags: <defaults>
</compile_context>

<pallas_src>
import functools

import jax
import jax.numpy as jnp
import numpy as np
from jax.experimental import pallas as pl
from jax.experimental.pallas import tpu as pltpu

BN_EPS = 1e-5
_VMEM_LIMIT = 32 * 1024 * 1024          # explicit scoped-VMEM limit (safe on v5e/v6e/v7x)
_BLOCK_VMEM_BUDGET = 16 * 1024 * 1024   # budget for the double-buffered blocks
_VPU_CONV_MAX_K = 32                    # use VPU broadcast-FMA conv for K <= this


def _conv1x1(w, pooled):
    """(cout, K) x (K, TM) -> (cout, TM) 1x1 conv.

    Tiny-K path: K broadcast-FMAs on the VPU (exact f32; the f32 MXU path
    would pad K to 128 and run multi-pass at ~0.1% utilization for cin=4).
    Large K: regular MXU dot with f32 accumulation."""
    k = w.shape[1]
    if k <= _VPU_CONV_MAX_K:
        y = w[:, 0:1] * pooled[0:1, :]
        for c in range(1, k):
            y = y + w[:, c:c + 1] * pooled[c:c + 1, :]
        return y
    return jnp.dot(w, pooled, preferred_element_type=jnp.float32)


# ---------------------------------------------------------------------------
# Sweep 1: per-image, per-channel sum / sum-of-squares of the un-normalized
# conv output.  Zero-padded spatial columns produce y == 0 exactly, so they
# never bias the statistics (we divide by the true M).
# ---------------------------------------------------------------------------
def _eve_stats_kernel(pooled_ref, w_ref, ssum_ref, ssq_ref):
    @pl.when(pl.program_id(1) == 0)
    def _():
        ssum_ref[...] = jnp.zeros_like(ssum_ref)
        ssq_ref[...] = jnp.zeros_like(ssq_ref)

    y = _conv1x1(w_ref[...], pooled_ref[...])          # (cout, TM)
    ssum_ref[...] += jnp.sum(y, axis=1, keepdims=True)
    ssq_ref[...] += jnp.sum(y * y, axis=1, keepdims=True)


# ---------------------------------------------------------------------------
# Sweep 2: recompute y with the BN scale folded into the conv weights and add
# the per-channel shift.  Embarrassingly parallel; lane-dense NCHW-flat stores.
# ---------------------------------------------------------------------------
def _eve_norm_kernel(pooled_ref, w_ref, shift_ref, out_ref):
    y = _conv1x1(w_ref[...], pooled_ref[...])
    out_ref[...] = (y + shift_ref[...]).astype(out_ref.dtype)


def _pick_tile(howo, cin, cout, tm):
    """Lane-dense tile of the per-image spatial axis.

    Targets >= ~512 KiB of pooled slab per grid step, caps by a VMEM formula
    (double-buffered pooled + out blocks), and rebalances the tile so the
    per-image padding of Ho*Wo stays small.  Returns (TM, HoWo_padded)."""
    if tm is None:
        target = max(128, ((512 * 1024) // max(1, 2 * cin * 4)) // 128 * 128)
        cap = max(128,
                  (_BLOCK_VMEM_BUDGET // (2 * (2 * cin + cout) * 4)) // 128 * 128)
        tm = min(target, cap)
    else:
        tm = max(128, (tm // 128) * 128)
    n_tiles = max(1, pl.cdiv(howo, tm))
    tm = pl.cdiv(howo, n_tiles * 128) * 128   # rebalance: limits pad waste
    return tm, n_tiles * tm


@functools.partial(jax.jit, static_argnames=("tm",))
def eve_forward(x, w, gamma, beta, *, tm=None):
    """x: (N, cin, H, W) f32, w: (cout, 2*cin), gamma/beta: (cout,).
    Returns (N, cout, ceil(H/2), ceil(W/2)); BatchNorm uses training-mode
    batch statistics (biased variance)."""
    N, cin, H, W = x.shape
    cout = w.shape[0]
    Ho, Wo = -(-H // 2), -(-W // 2)
    HoWo = Ho * Wo
    M = N * HoWo

    # --- pooling in the wrapper (single fused XLA pass over x) --------------
    # Edge-replicate padding reproduces ceil_mode exactly for BOTH max and min
    # pooling (the replicated value is already inside the window).
    if (2 * Ho, 2 * Wo) != (H, W):
        x = jnp.pad(x, ((0, 0), (0, 0), (0, 2 * Ho - H), (0, 2 * Wo - W)),
                    mode="edge")
    win = x.astype(jnp.float32).reshape(N, cin, Ho, 2, Wo, 2)
    mx = win.max(axis=(3, 5))                            # maxpool (N,cin,Ho,Wo)
    mn = win.min(axis=(3, 5))                            # minpool
    # Channel concat order matches th.cat((maxpool, minpool), 1).
    pooled = jnp.concatenate([mx, mn], axis=1).reshape(N, 2 * cin, HoWo)

    TM, HoWo_p = _pick_tile(HoWo, cin, cout, tm)
    if HoWo_p != HoWo:
        # Zero columns: contribute y == 0 to the stats (divide by true M) and
        # are sliced off after the normalize sweep.
        pooled = jnp.pad(pooled, ((0, 0), (0, 0), (0, HoWo_p - HoWo)))
    grid = (N, HoWo_p // TM)

    w = w.astype(jnp.float32)

    pooled_spec = pl.BlockSpec((None, 2 * cin, TM), lambda n, m: (n, 0, m))
    w_spec = pl.BlockSpec((cout, 2 * cin), lambda n, m: (0, 0))
    col_out_spec = pl.BlockSpec((None, cout, 1), lambda n, m: (n, 0, 0))
    shift_spec = pl.BlockSpec((cout, 1), lambda n, m: (0, 0))

    dot_flops = 2 * cout * 2 * cin * N * HoWo_p
    slab_bytes = 2 * cin * N * HoWo_p * 4

    # ---- sweep 1: batch statistics of the un-normalized conv output --------
    # N axis "parallel" (both TCs on v7x), m axis "arbitrary" (reduction);
    # per-image partial accumulators, reduced across N in XLA below.
    ssum, ssq = pl.pallas_call(
        _eve_stats_kernel,
        grid=grid,
        in_specs=[pooled_spec, w_spec],
        out_specs=(col_out_spec, col_out_spec),
        out_shape=(jax.ShapeDtypeStruct((N, cout, 1), jnp.float32),
                   jax.ShapeDtypeStruct((N, cout, 1), jnp.float32)),
        compiler_params=pltpu.CompilerParams(
            dimension_semantics=("parallel", "arbitrary"),
            vmem_limit_bytes=_VMEM_LIMIT),
        cost_estimate=pl.CostEstimate(
            flops=dot_flops + 3 * cout * N * HoWo_p, transcendentals=0,
            bytes_accessed=slab_bytes + (2 * cout * cin + 2 * N * cout) * 4),
    )(pooled, w)

    # ---- fold BN (training-mode batch stats) into per-channel scale/shift --
    # TODO(synk): E[y^2]-E[y]^2 in f32 can cancel for |mean| >> std at huge M;
    # a Welford / centered accumulation would be more robust there.
    mean = jnp.sum(ssum[:, :, 0], axis=0) / M
    ex2 = jnp.sum(ssq[:, :, 0], axis=0) / M
    var = jnp.maximum(ex2 - mean * mean, 0.0)            # biased variance
    scale = gamma.astype(jnp.float32) * jax.lax.rsqrt(var + BN_EPS)
    shift = beta.astype(jnp.float32) - mean * scale
    w_scaled = w * scale[:, None]

    # ---- sweep 2: y = scaled-conv + shift, NCHW-flat lane-dense stores -----
    out = pl.pallas_call(
        _eve_norm_kernel,
        grid=grid,
        in_specs=[pooled_spec, w_spec, shift_spec],
        out_specs=pl.BlockSpec((None, cout, TM), lambda n, m: (n, 0, m)),
        out_shape=jax.ShapeDtypeStruct((N, cout, HoWo_p), jnp.float32),
        compiler_params=pltpu.CompilerParams(
            dimension_semantics=("parallel", "parallel"),
            vmem_limit_bytes=_VMEM_LIMIT),
        cost_estimate=pl.CostEstimate(
            flops=dot_flops + cout * N * HoWo_p, transcendentals=0,
            bytes_accessed=slab_bytes + cout * N * HoWo_p * 4
                           + (2 * cout * cin + cout) * 4),
    )(pooled, w_scaled, shift[:, None])

    # NCHW result: free reshape when HoWo is already a multiple of 128,
    # otherwise a contiguous per-row slice (no transpose pass).
    if HoWo_p != HoWo:
        out = out[:, :, :HoWo]
    return out.reshape(N, cout, Ho, Wo)


def eve_reference(x, w, gamma, beta):
    """Pure-JAX reference for verification (f32-accurate contraction)."""
    N, cin, H, W = x.shape
    Ho, Wo = -(-H // 2), -(-W // 2)
    x_p = jnp.pad(x, ((0, 0), (0, 0), (0, 2 * Ho - H), (0, 2 * Wo - W)),
                  mode="edge")
    win = x_p.reshape(N, cin, Ho, 2, Wo, 2)
    mx = win.max(axis=(3, 5))
    mn = win.min(axis=(3, 5))
    cat = jnp.concatenate([mx, mn], axis=1)              # (N, 2cin, Ho, Wo)
    y = jnp.einsum("oc,nchw->nohw", w, cat,
                   precision=jax.lax.Precision.HIGHEST)
    mean = y.mean(axis=(0, 2, 3), keepdims=True)
    var = ((y - mean) ** 2).mean(axis=(0, 2, 3), keepdims=True)
    g = gamma.reshape(1, -1, 1, 1)
    b = beta.reshape(1, -1, 1, 1)
    return g * (y - mean) / jnp.sqrt(var + BN_EPS) + b


if __name__ == "__main__":
    key = jax.random.PRNGKey(0)
    kx, kw, kx2 = jax.random.split(key, 3)

    # Primary case.
    N, cin, cout, H, W = 2, 4, 8, 16, 16
    x = jax.random.normal(kx, (N, cin, H, W), dtype=jnp.float32)

    # Deterministic parameter init (shapes from EVE.__init__):
    #   pw.weight: (cout, 2*cin, 1, 1) -> squeezed to (cout, 2*cin)
    #   bn.weight (gamma)=1, bn.bias (beta)=0
    w = 0.1 * jax.random.normal(kw, (cout, 2 * cin), dtype=jnp.float32)
    gamma = jnp.ones((cout,), dtype=jnp.float32)
    beta = jnp.zeros((cout,), dtype=jnp.float32)

    out = jax.block_until_ready(eve_forward(x, w, gamma, beta))
    ref = jax.block_until_ready(eve_reference(x, w, gamma, beta))
    assert out.shape == (N, cout, -(-H // 2), -(-W // 2))
    np.testing.assert_allclose(np.asarray(out), np.asarray(ref),
                               rtol=1e-4, atol=1e-4)

    # Secondary case: odd spatial dims (ceil_mode), lane padding of Ho*Wo.
    x2 = jax.random.normal(kx2, (2, cin, 19, 15), dtype=jnp.float32)
    out2 = jax.block_until_ready(eve_forward(x2, w, gamma, beta, tm=128))
    ref2 = jax.block_until_ready(eve_reference(x2, w, gamma, beta))
    np.testing.assert_allclose(np.asarray(out2), np.asarray(ref2),
                               rtol=1e-4, atol=1e-4)

    print("KERNEL_OK")
</pallas_src>

<mosaic_0001>
module attributes {stable_mosaic.version = 11 : i64} {
  func.func @_eve_stats_kernel(%arg0: i32, %arg1: i32, %arg2: memref<1x8x128xf32, #tpu.memory_space<vmem>>, %arg3: memref<8x8xf32, #tpu.memory_space<vmem>>, %arg4: memref<1x8x1xf32, #tpu.memory_space<vmem>>, %arg5: memref<1x8x1xf32, #tpu.memory_space<vmem>>) attributes {dimension_semantics = [#tpu.dimension_semantics<parallel>, #tpu.dimension_semantics<arbitrary>], iteration_bounds = array<i64: 2, 1>, scalar_prefetch = 0 : i64, scratch_operands = 0 : i64, tpu.core_type = #tpu.core_type<tc>, window_params = [{transform_indices = @transform_0, window_bounds = array<i64: 1, 8, 128>}, {pipeline_mode = #tpu.pipeline_mode<synchronous>, transform_indices = @transform_1, window_bounds = array<i64: 8, 8>}, {transform_indices = @transform_2, window_bounds = array<i64: 1, 8, 1>}, {transform_indices = @transform_3, window_bounds = array<i64: 1, 8, 1>}]} {
    %c0_i32 = arith.constant 0 : i32
    %0 = arith.cmpi eq, %arg1, %c0_i32 : i32
    %1 = arith.extui %0 : i1 to i32
    %c0_i32_0 = arith.constant 0 : i32
    %2 = arith.cmpi ne, %1, %c0_i32_0 : i32
    scf.if %2 {
      %cst_18 = arith.constant 0.000000e+00 : f32
      %70 = vector.broadcast %cst_18 : f32 to vector<8x1xf32>
      %c0_19 = arith.constant 0 : index
      %c0_20 = arith.constant 0 : index
      %c0_21 = arith.constant 0 : index
      %71 = vector.load %arg4[%c0_19, %c0_20, %c0_21] : memref<1x8x1xf32, #tpu.memory_space<vmem>>, vector<1x8x1xf32>
      %72 = vector.shape_cast %71 : vector<1x8x1xf32> to vector<8x1xf32>
      %73 = vector.shape_cast %70 : vector<8x1xf32> to vector<1x8x1xf32>
      tpu.vector_store %arg4[%c0_19, %c0_20, %c0_21], %73 {strides = array<i32>} : memref<1x8x1xf32, #tpu.memory_space<vmem>>, vector<1x8x1xf32>,
      %cst_22 = arith.constant 0.000000e+00 : f32
      %74 = vector.broadcast %cst_22 : f32 to vector<8x1xf32>
      %c0_23 = arith.constant 0 : index
      %c0_24 = arith.constant 0 : index
      %c0_25 = arith.constant 0 : index
      %75 = vector.load %arg5[%c0_23, %c0_24, %c0_25] : memref<1x8x1xf32, #tpu.memory_space<vmem>>, vector<1x8x1xf32>
      %76 = vector.shape_cast %75 : vector<1x8x1xf32> to vector<8x1xf32>
      %77 = vector.shape_cast %74 : vector<8x1xf32> to vector<1x8x1xf32>
      tpu.vector_store %arg5[%c0_23, %c0_24, %c0_25], %77 {strides = array<i32>} : memref<1x8x1xf32, #tpu.memory_space<vmem>>, vector<1x8x1xf32>,
    } else {
    }
    %c0 = arith.constant 0 : index
    %c0_1 = arith.constant 0 : index
    %3 = vector.load %arg3[%c0, %c0_1] : memref<8x8xf32, #tpu.memory_space<vmem>>, vector<8x8xf32>
    %c0_2 = arith.constant 0 : index
    %c0_3 = arith.constant 0 : index
    %c0_4 = arith.constant 0 : index
    %4 = vector.load %arg2[%c0_2, %c0_3, %c0_4] : memref<1x8x128xf32, #tpu.memory_space<vmem>>, vector<1x8x128xf32>
    %5 = vector.shape_cast %4 : vector<1x8x128xf32> to vector<8x128xf32>
    %6 = vector.extract_strided_slice %3 {offsets = [0, 0], sizes = [8, 1], strides = [1, 1]} : vector<8x8xf32> to vector<8x1xf32>
    %7 = vector.extract_strided_slice %5 {offsets = [0, 0], sizes = [1, 128], strides = [1, 1]} : vector<8x128xf32> to vector<1x128xf32>
    %8 = vector.broadcast %6 : vector<8x1xf32> to vector<8x128xf32>
    %9 = vector.broadcast %7 : vector<1x128xf32> to vector<8x128xf32>
    %10 = arith.mulf %8, %9 : vector<8x128xf32>
    %11 = vector.extract_strided_slice %3 {offsets = [0, 1], sizes = [8, 1], strides = [1, 1]} : vector<8x8xf32> to vector<8x1xf32>
    %12 = vector.extract_strided_slice %5 {offsets = [1, 0], sizes = [1, 128], strides = [1, 1]} : vector<8x128xf32> to vector<1x128xf32>
    %13 = vector.broadcast %11 : vector<8x1xf32> to vector<8x128xf32>
    %14 = vector.broadcast %12 : vector<1x128xf32> to vector<8x128xf32>
    %15 = arith.mulf %13, %14 : vector<8x128xf32>
    %16 = arith.addf %10, %15 : vector<8x128xf32>
    %17 = vector.extract_strided_slice %3 {offsets = [0, 2], sizes = [8, 1], strides = [1, 1]} : vector<8x8xf32> to vector<8x1xf32>
    %18 = vector.extract_strided_slice %5 {offsets = [2, 0], sizes = [1, 128], strides = [1, 1]} : vector<8x128xf32> to vector<1x128xf32>
    %19 = vector.broadcast %17 : vector<8x1xf32> to vector<8x128xf32>
    %20 = vector.broadcast %18 : vector<1x128xf32> to vector<8x128xf32>
    %21 = arith.mulf %19, %20 : vector<8x128xf32>
    %22 = arith.addf %16, %21 : vector<8x128xf32>
    %23 = vector.extract_strided_slice %3 {offsets = [0, 3], sizes = [8, 1], strides = [1, 1]} : vector<8x8xf32> to vector<8x1xf32>
    %24 = vector.extract_strided_slice %5 {offsets = [3, 0], sizes = [1, 128], strides = [1, 1]} : vector<8x128xf32> to vector<1x128xf32>
    %25 = vector.broadcast %23 : vector<8x1xf32> to vector<8x128xf32>
    %26 = vector.broadcast %24 : vector<1x128xf32> to vector<8x128xf32>
    %27 = arith.mulf %25, %26 : vector<8x128xf32>
    %28 = arith.addf %22, %27 : vector<8x128xf32>
    %29 = vector.extract_strided_slice %3 {offsets = [0, 4], sizes = [8, 1], strides = [1, 1]} : vector<8x8xf32> to vector<8x1xf32>
    %30 = vector.extract_strided_slice %5 {offsets = [4, 0], sizes = [1, 128], strides = [1, 1]} : vector<8x128xf32> to vector<1x128xf32>
    %31 = vector.broadcast %29 : vector<8x1xf32> to vector<8x128xf32>
    %32 = vector.broadcast %30 : vector<1x128xf32> to vector<8x128xf32>
    %33 = arith.mulf %31, %32 : vector<8x128xf32>
    %34 = arith.addf %28, %33 : vector<8x128xf32>
    %35 = vector.extract_strided_slice %3 {offsets = [0, 5], sizes = [8, 1], strides = [1, 1]} : vector<8x8xf32> to vector<8x1xf32>
    %36 = vector.extract_strided_slice %5 {offsets = [5, 0], sizes = [1, 128], strides = [1, 1]} : vector<8x128xf32> to vector<1x128xf32>
    %37 = vector.broadcast %35 : vector<8x1xf32> to vector<8x128xf32>
    %38 = vector.broadcast %36 : vector<1x128xf32> to vector<8x128xf32>
    %39 = arith.mulf %37, %38 : vector<8x128xf32>
    %40 = arith.addf %34, %39 : vector<8x128xf32>
    %41 = vector.extract_strided_slice %3 {offsets = [0, 6], sizes = [8, 1], strides = [1, 1]} : vector<8x8xf32> to vector<8x1xf32>
    %42 = vector.extract_strided_slice %5 {offsets = [6, 0], sizes = [1, 128], strides = [1, 1]} : vector<8x128xf32> to vector<1x128xf32>
    %43 = vector.broadcast %41 : vector<8x1xf32> to vector<8x128xf32>
    %44 = vector.broadcast %42 : vector<1x128xf32> to vector<8x128xf32>
    %45 = arith.mulf %43, %44 : vector<8x128xf32>
    %46 = arith.addf %40, %45 : vector<8x128xf32>
    %47 = vector.extract_strided_slice %3 {offsets = [0, 7], sizes = [8, 1], strides = [1, 1]} : vector<8x8xf32> to vector<8x1xf32>
    %48 = vector.extract_strided_slice %5 {offsets = [7, 0], sizes = [1, 128], strides = [1, 1]} : vector<8x128xf32> to vector<1x128xf32>
    %49 = vector.broadcast %47 : vector<8x1xf32> to vector<8x128xf32>
    %50 = vector.broadcast %48 : vector<1x128xf32> to vector<8x128xf32>
    %51 = arith.mulf %49, %50 : vector<8x128xf32>
    %52 = arith.addf %46, %51 : vector<8x128xf32>
    %c0_5 = arith.constant 0 : index
    %c0_6 = arith.constant 0 : index
    %c0_7 = arith.constant 0 : index
    %53 = vector.load %arg4[%c0_5, %c0_6, %c0_7] : memref<1x8x1xf32, #tpu.memory_space<vmem>>, vector<1x8x1xf32>
    %54 = vector.shape_cast %53 : vector<1x8x1xf32> to vector<8x1xf32>
    %cst = arith.constant dense<0.000000e+00> : vector<8xf32>
    %55 = vector.multi_reduction <add>, %52, %cst [1] : vector<8x128xf32> to vector<8xf32>
    %56 = vector.shape_cast %55 : vector<8xf32> to vector<8x1xf32>
    %57 = arith.addf %54, %56 : vector<8x1xf32>
    %c0_8 = arith.constant 0 : index
    %c0_9 = arith.constant 0 : index
    %c0_10 = arith.constant 0 : index
    %58 = vector.load %arg4[%c0_8, %c0_9, %c0_10] : memref<1x8x1xf32, #tpu.memory_space<vmem>>, vector<1x8x1xf32>
    %59 = vector.shape_cast %58 : vector<1x8x1xf32> to vector<8x1xf32>
    %60 = vector.shape_cast %57 : vector<8x1xf32> to vector<1x8x1xf32>
    tpu.vector_store %arg4[%c0_8, %c0_9, %c0_10], %60 {strides = array<i32>} : memref<1x8x1xf32, #tpu.memory_space<vmem>>, vector<1x8x1xf32>,
    %c0_11 = arith.constant 0 : index
    %c0_12 = arith.constant 0 : index
    %c0_13 = arith.constant 0 : index
    %61 = vector.load %arg5[%c0_11, %c0_12, %c0_13] : memref<1x8x1xf32, #tpu.memory_space<vmem>>, vector<1x8x1xf32>
    %62 = vector.shape_cast %61 : vector<1x8x1xf32> to vector<8x1xf32>
    %63 = arith.mulf %52, %52 : vector<8x128xf32>
    %cst_14 = arith.constant dense<0.000000e+00> : vector<8xf32>
    %64 = vector.multi_reduction <add>, %63, %cst_14 [1] : vector<8x128xf32> to vector<8xf32>
    %65 = vector.shape_cast %64 : vector<8xf32> to vector<8x1xf32>
    %66 = arith.addf %62, %65 : vector<8x1xf32>
    %c0_15 = arith.constant 0 : index
    %c0_16 = arith.constant 0 : index
    %c0_17 = arith.constant 0 : index
    %67 = vector.load %arg5[%c0_15, %c0_16, %c0_17] : memref<1x8x1xf32, #tpu.memory_space<vmem>>, vector<1x8x1xf32>
    %68 = vector.shape_cast %67 : vector<1x8x1xf32> to vector<8x1xf32>
    %69 = vector.shape_cast %66 : vector<8x1xf32> to vector<1x8x1xf32>
    tpu.vector_store %arg5[%c0_15, %c0_16, %c0_17], %69 {strides = array<i32>} : memref<1x8x1xf32, #tpu.memory_space<vmem>>, vector<1x8x1xf32>,
    return
  }
  func.func @transform_0(%arg0: i32, %arg1: i32) -> (i32, i32, i32) {
    %c0_i32 = arith.constant 0 : i32
    %c0_i32_0 = arith.constant 0 : i32
    return %arg0, %c0_i32, %arg1 : i32, i32, i32
  }
  func.func @transform_1(%arg0: i32, %arg1: i32) -> (i32, i32) {
    %c0_i32 = arith.constant 0 : i32
    %c0_i32_0 = arith.constant 0 : i32
    %c0_i32_1 = arith.constant 0 : i32
    return %c0_i32, %c0_i32_0 : i32, i32
  }
  func.func @transform_2(%arg0: i32, %arg1: i32) -> (i32, i32, i32) {
    %c0_i32 = arith.constant 0 : i32
    %c0_i32_0 = arith.constant 0 : i32
    %c0_i32_1 = arith.constant 0 : i32
    return %arg0, %c0_i32, %c0_i32_0 : i32, i32, i32
  }
  func.func @transform_3(%arg0: i32, %arg1: i32) -> (i32, i32, i32) {
    %c0_i32 = arith.constant 0 : i32
    %c0_i32_0 = arith.constant 0 : i32
    %c0_i32_1 = arith.constant 0 : i32
    return %arg0, %c0_i32, %c0_i32_0 : i32, i32, i32
  }
}

module attributes {stable_mosaic.version = 11 : i64} {
  func.func @_eve_norm_kernel(%arg0: i32, %arg1: i32, %arg2: memref<1x8x128xf32, #tpu.memory_space<vmem>>, %arg3: memref<8x8xf32, #tpu.memory_space<vmem>>, %arg4: memref<8x1xf32, #tpu.memory_space<vmem>>, %arg5: memref<1x8x128xf32, #tpu.memory_space<vmem>>) attributes {dimension_semantics = [#tpu.dimension_semantics<parallel>, #tpu.dimension_semantics<parallel>], iteration_bounds = array<i64: 2, 1>, scalar_prefetch = 0 : i64, scratch_operands = 0 : i64, tpu.core_type = #tpu.core_type<tc>, window_params = [{transform_indices = @transform_0, window_bounds = array<i64: 1, 8, 128>}, {pipeline_mode = #tpu.pipeline_mode<synchronous>, transform_indices = @transform_1, window_bounds = array<i64: 8, 8>}, {pipeline_mode = #tpu.pipeline_mode<synchronous>, transform_indices = @transform_2, window_bounds = array<i64: 8, 1>}, {transform_indices = @transform_3, window_bounds = array<i64: 1, 8, 128>}]} {
    %c0 = arith.constant 0 : index
    %c0_0 = arith.constant 0 : index
    %0 = vector.load %arg3[%c0, %c0_0] : memref<8x8xf32, #tpu.memory_space<vmem>>, vector<8x8xf32>
    %c0_1 = arith.constant 0 : index
    %c0_2 = arith.constant 0 : index
    %c0_3 = arith.constant 0 : index
    %1 = vector.load %arg2[%c0_1, %c0_2, %c0_3] : memref<1x8x128xf32, #tpu.memory_space<vmem>>, vector<1x8x128xf32>
    %2 = vector.shape_cast %1 : vector<1x8x128xf32> to vector<8x128xf32>
    %3 = vector.extract_strided_slice %0 {offsets = [0, 0], sizes = [8, 1], strides = [1, 1]} : vector<8x8xf32> to vector<8x1xf32>
    %4 = vector.extract_strided_slice %2 {offsets = [0, 0], sizes = [1, 128], strides = [1, 1]} : vector<8x128xf32> to vector<1x128xf32>
    %5 = vector.broadcast %3 : vector<8x1xf32> to vector<8x128xf32>
    %6 = vector.broadcast %4 : vector<1x128xf32> to vector<8x128xf32>
    %7 = arith.mulf %5, %6 : vector<8x128xf32>
    %8 = vector.extract_strided_slice %0 {offsets = [0, 1], sizes = [8, 1], strides = [1, 1]} : vector<8x8xf32> to vector<8x1xf32>
    %9 = vector.extract_strided_slice %2 {offsets = [1, 0], sizes = [1, 128], strides = [1, 1]} : vector<8x128xf32> to vector<1x128xf32>
    %10 = vector.broadcast %8 : vector<8x1xf32> to vector<8x128xf32>
    %11 = vector.broadcast %9 : vector<1x128xf32> to vector<8x128xf32>
    %12 = arith.mulf %10, %11 : vector<8x128xf32>
    %13 = arith.addf %7, %12 : vector<8x128xf32>
    %14 = vector.extract_strided_slice %0 {offsets = [0, 2], sizes = [8, 1], strides = [1, 1]} : vector<8x8xf32> to vector<8x1xf32>
    %15 = vector.extract_strided_slice %2 {offsets = [2, 0], sizes = [1, 128], strides = [1, 1]} : vector<8x128xf32> to vector<1x128xf32>
    %16 = vector.broadcast %14 : vector<8x1xf32> to vector<8x128xf32>
    %17 = vector.broadcast %15 : vector<1x128xf32> to vector<8x128xf32>
    %18 = arith.mulf %16, %17 : vector<8x128xf32>
    %19 = arith.addf %13, %18 : vector<8x128xf32>
    %20 = vector.extract_strided_slice %0 {offsets = [0, 3], sizes = [8, 1], strides = [1, 1]} : vector<8x8xf32> to vector<8x1xf32>
    %21 = vector.extract_strided_slice %2 {offsets = [3, 0], sizes = [1, 128], strides = [1, 1]} : vector<8x128xf32> to vector<1x128xf32>
    %22 = vector.broadcast %20 : vector<8x1xf32> to vector<8x128xf32>
    %23 = vector.broadcast %21 : vector<1x128xf32> to vector<8x128xf32>
    %24 = arith.mulf %22, %23 : vector<8x128xf32>
    %25 = arith.addf %19, %24 : vector<8x128xf32>
    %26 = vector.extract_strided_slice %0 {offsets = [0, 4], sizes = [8, 1], strides = [1, 1]} : vector<8x8xf32> to vector<8x1xf32>
    %27 = vector.extract_strided_slice %2 {offsets = [4, 0], sizes = [1, 128], strides = [1, 1]} : vector<8x128xf32> to vector<1x128xf32>
    %28 = vector.broadcast %26 : vector<8x1xf32> to vector<8x128xf32>
    %29 = vector.broadcast %27 : vector<1x128xf32> to vector<8x128xf32>
    %30 = arith.mulf %28, %29 : vector<8x128xf32>
    %31 = arith.addf %25, %30 : vector<8x128xf32>
    %32 = vector.extract_strided_slice %0 {offsets = [0, 5], sizes = [8, 1], strides = [1, 1]} : vector<8x8xf32> to vector<8x1xf32>
    %33 = vector.extract_strided_slice %2 {offsets = [5, 0], sizes = [1, 128], strides = [1, 1]} : vector<8x128xf32> to vector<1x128xf32>
    %34 = vector.broadcast %32 : vector<8x1xf32> to vector<8x128xf32>
    %35 = vector.broadcast %33 : vector<1x128xf32> to vector<8x128xf32>
    %36 = arith.mulf %34, %35 : vector<8x128xf32>
    %37 = arith.addf %31, %36 : vector<8x128xf32>
    %38 = vector.extract_strided_slice %0 {offsets = [0, 6], sizes = [8, 1], strides = [1, 1]} : vector<8x8xf32> to vector<8x1xf32>
    %39 = vector.extract_strided_slice %2 {offsets = [6, 0], sizes = [1, 128], strides = [1, 1]} : vector<8x128xf32> to vector<1x128xf32>
    %40 = vector.broadcast %38 : vector<8x1xf32> to vector<8x128xf32>
    %41 = vector.broadcast %39 : vector<1x128xf32> to vector<8x128xf32>
    %42 = arith.mulf %40, %41 : vector<8x128xf32>
    %43 = arith.addf %37, %42 : vector<8x128xf32>
    %44 = vector.extract_strided_slice %0 {offsets = [0, 7], sizes = [8, 1], strides = [1, 1]} : vector<8x8xf32> to vector<8x1xf32>
    %45 = vector.extract_strided_slice %2 {offsets = [7, 0], sizes = [1, 128], strides = [1, 1]} : vector<8x128xf32> to vector<1x128xf32>
    %46 = vector.broadcast %44 : vector<8x1xf32> to vector<8x128xf32>
    %47 = vector.broadcast %45 : vector<1x128xf32> to vector<8x128xf32>
    %48 = arith.mulf %46, %47 : vector<8x128xf32>
    %49 = arith.addf %43, %48 : vector<8x128xf32>
    %c0_4 = arith.constant 0 : index
    %c0_5 = arith.constant 0 : index
    %50 = vector.load %arg4[%c0_4, %c0_5] : memref<8x1xf32, #tpu.memory_space<vmem>>, vector<8x1xf32>
    %51 = vector.broadcast %50 : vector<8x1xf32> to vector<8x128xf32>
    %52 = arith.addf %49, %51 : vector<8x128xf32>
    %c0_6 = arith.constant 0 : index
    %c0_7 = arith.constant 0 : index
    %c0_8 = arith.constant 0 : index
    %53 = vector.load %arg5[%c0_6, %c0_7, %c0_8] : memref<1x8x128xf32, #tpu.memory_space<vmem>>, vector<1x8x128xf32>
    %54 = vector.shape_cast %53 : vector<1x8x128xf32> to vector<8x128xf32>
    %55 = vector.shape_cast %52 : vector<8x128xf32> to vector<1x8x128xf32>
    tpu.vector_store %arg5[%c0_6, %c0_7, %c0_8], %55 {strides = array<i32>} : memref<1x8x128xf32, #tpu.memory_space<vmem>>, vector<1x8x128xf32>,
    return
  }
  func.func @transform_0(%arg0: i32, %arg1: i32) -> (i32, i32, i32) {
    %c0_i32 = arith.constant 0 : i32
    %c0_i32_0 = arith.constant 0 : i32
    return %arg0, %c0_i32, %arg1 : i32, i32, i32
  }
  func.func @transform_1(%arg0: i32, %arg1: i32) -> (i32, i32) {
    %c0_i32 = arith.constant 0 : i32
    %c0_i32_0 = arith.constant 0 : i32
    %c0_i32_1 = arith.constant 0 : i32
    return %c0_i32, %c0_i32_0 : i32, i32
  }
  func.func @transform_2(%arg0: i32, %arg1: i32) -> (i32, i32) {
    %c0_i32 = arith.constant 0 : i32
    %c0_i32_0 = arith.constant 0 : i32
    %c0_i32_1 = arith.constant 0 : i32
    return %c0_i32, %c0_i32_0 : i32, i32
  }
  func.func @transform_3(%arg0: i32, %arg1: i32) -> (i32, i32, i32) {
    %c0_i32 = arith.constant 0 : i32
    %c0_i32_0 = arith.constant 0 : i32
    return %arg0, %c0_i32, %arg1 : i32, i32, i32
  }
}

</mosaic_0001>

<bundles_post_ra>
// kernel: eve_forward.3
= control target key start
LH: loop header
LB: loop body
LE: loop exit
PB: predicated region body
PF: predicated region fallthrough
CT: control target
= control target key end

     0   :  { %s463_s12 = smov 0   ;;  %s465_s13 = smov 0   ;;  %s513_s0 = inlined_call_operand.vmem [shape: f32[2,8,128], index: 0, kind: input, shape index: {}]   ;;  %s514_s1 = inlined_call_operand.vmem [shape: f32[8,8], index: 1, kind: input, shape index: {}]   ;;  %s515_s2 = inlined_call_operand.vmem [shape: f32[8,1], index: 2, kind: input, shape index: {}]   ;;  %s516_s3 = inlined_call_operand.vmem [shape: f32[2,8,128], index: 3, kind: output, shape index: {}]  }
   0x1   :  { %s467_s14 = smov 0  }
   0x2 LB: > { %s25_s15 = sadd.s32 1, %s429_s13  ;;  %p365_p0 = scmp.ge.s32.totalorder %s433_s14, 1  ;;  %s433_s14 = sphi %s467_s14, %s13_s14   ;;  %s429_s13 = sphi %s465_s13, %s518_s13   ;;  %s425_s12 = sphi %s463_s12, %s517_s12  }
   0x3   : > { %p27_p1 = scmp.ge.s32.totalorder %s25_s15, 2  ;;  %p155_p2 = scmp.lt.s32.totalorder %s433_s14, 3 }
   0x5   : > { %s520_s15 = smov (%p27_p1, %s25_s15), 0  ;;  %p156_p3 = pnand %p365_p0, %p155_p2 }
   0x6   : > { %p183_p4 = scmp.lt.s32.totalorder (!%p156_p3), %s425_s12, 1 }
   0x7   : > { %159 = sbr.rel (%p156_p3) target bundleno = 165 (0xa5), region = 32 }
   0xc   : > { %v197_v0 = vld [vmem:[%s514_s1] sm:$0xff]  ;;  %v435_v1 = vmov 2   ;;  %v436_v2 = vmov 0   ;;  %v437_v3 = vmov 3   ;;  %v438_v4 = vmov 1   ;;  %s522_s12 = smov (!%p183_p4, %s425_s12), 1 }
   0xd   : > { %404 = vset.pattern.permute.xlu1 %v435_v1  ;;  %402 = vset.pattern.permute.xlu0 %v436_v2  ;;  %v439_v5 = vmov 4   ;;  %v440_v6 = vmov 5   ;;  %v279_v7 = vld [vmem:[%s515_s2] sm:$0xff]  ;;  %v441_v8 = vmov 6   ;;  %v442_v9 = vmov 7   ;;  %s366_s20 = sshll.u32 %s522_s12, 3 }
   0xe   : > { %220 = vperm.xlu1 %404, %v197_v0   ;;  %201 = vperm.xlu0 %402, %v197_v0   ;;  %v204_v10 = vlaneseq  ;;  %s189_s23 = scalar_lea.vmem %s513_s0, %s366_s20  ;;  %s196_s26 = scalar_lea.vmem %s516_s3, %s366_s20 }
   0xf   : > { %v198_v17 = vld [vmem:[%s189_s23] sm:$0xff] }
  0x10   : > { %v205_v11 = vshrl.u32 %v204_v10, 7 }
  0x12   : > { %405 = vset.pattern.permute.xlu1 %v437_v3  ;;  %403 = vset.pattern.permute.xlu0 %v438_v4  ;;  %v206_v12 = vsub.s32 0, %v205_v11  ;;  %v215_v13 = vsub.s32 1, %v205_v11  ;;  %v225_v14 = vsub.s32 2, %v205_v11  ;;  %v235_v19 = vsub.s32 3, %v205_v11 }
  0x13   : > { %230 = vperm.xlu1 %405, %v197_v0   ;;  %210 = vperm.xlu0 %403, %v197_v0   ;;  %v245_v21 = vsub.s32 4, %v205_v11  ;;  %v255_v25 = vsub.s32 5, %v205_v11  ;;  %v265_v33 = vsub.s32 6, %v205_v11  ;;  %v275_v42 = vsub.s32 7, %v205_v11 }
  0x14   : > { %v207_v18 = vrot.slane %v198_v17, %v206_v12  ;;  %v216_v20 = vrot.slane %v198_v17, %v215_v13  ;;  %v226_v22 = vrot.slane %v198_v17, %v225_v14  ;;  %v236_v27 = vrot.slane %v198_v17, %v235_v19 }
  0x15   : > { %v246_v29 = vrot.slane %v198_v17, %v245_v21  ;;  %v256_v32 = vrot.slane %v198_v17, %v255_v25  ;;  %v266_v41 = vrot.slane %v198_v17, %v265_v33  ;;  %v276_v47 = vrot.slane %v198_v17, %v275_v42 }
  0x17   : > { %406 = vset.pattern.permute.xlu1 %v439_v5  ;;  %407 = vset.pattern.permute.xlu0 %v440_v6 }
  0x18   : > { %240 = vperm.xlu1 %406, %v197_v0   ;;  %250 = vperm.xlu0 %407, %v197_v0  }
  0x1c   : > { %408 = vset.pattern.permute.xlu1 %v441_v8  ;;  %410 = vset.pattern.permute.xlu0 %v436_v2 }
  0x1d   : > { %260 = vperm.xlu1 %408, %v197_v0   ;;  %282 = vperm.xlu0 %410, %v279_v7  }
  0x21   : > { %409 = vset.pattern.permute.xlu1 %v442_v9 }
  0x22   : > { %270 = vperm.xlu1 %409, %v197_v0  }
  0x89   : > { %v221_v15 = vpop.permute.xlu1 %220  ;;  %v202_v16 = vpop.permute.xlu0 %201 }
  0x8a   : > { %v208_v26 = vmul.f32 %v207_v18, %v202_v16  ;;  %v227_v30 = vmul.f32 %v226_v22, %v221_v15 }
  0x8e   : > { %v231_v23 = vpop.permute.xlu1 %230  ;;  %v211_v24 = vpop.permute.xlu0 %210 }
  0x8f   : > { %v217_v28 = vmul.f32 %v216_v20, %v211_v24  ;;  %v237_v34 = vmul.f32 %v236_v27, %v231_v23 }
  0x91   : > { %v218_v31 = vadd.f32 %v217_v28, %v208_v26 }
  0x93   : > { %v228_v35 = vadd.f32 %v227_v30, %v218_v31  ;;  %v241_v36 = vpop.permute.xlu1 %240  ;;  %v251_v37 = vpop.permute.xlu0 %250 }
  0x94   : > { %v247_v38 = vmul.f32 %v246_v29, %v241_v36  ;;  %v257_v40 = vmul.f32 %v256_v32, %v251_v37 }
  0x95   : > { %v238_v39 = vadd.f32 %v237_v34, %v228_v35 }
  0x97   : > { %v248_v43 = vadd.f32 %v247_v38, %v238_v39 }
  0x98   : > { %v261_v44 = vpop.permute.xlu1 %260  ;;  %v283_v51 = vpop.permute.xlu0 %282 }
  0x99   : > { %v258_v45 = vadd.f32 %v257_v40, %v248_v43  ;;  %v267_v46 = vmul.f32 %v266_v41, %v261_v44 }
  0x9b   : > { %v268_v49 = vadd.f32 %v267_v46, %v258_v45 }
  0x9d   : > { %v271_v48 = vpop.permute.xlu1 %270 }
  0x9e   : > { %v277_v50 = vmul.f32 %v276_v47, %v271_v48 }
  0xa0   : > { %v278_v52 = vadd.f32 %v277_v50, %v268_v49 }
  0xa2   : > { %v285_v53 = vadd.f32 %v283_v51, %v278_v52 }
  0xa4   : > { %286 = vst [vmem:[%s196_s26] sm:$0xff] %v285_v53 }
  0xa5 PF: > { %s13_s14 = sadd.s32 1, %s433_s14   ;;  %s517_s12 = smov %s429_s13 }
  0xa6   : > { %p10_p5 = scmp.ge.s32.totalorder %s13_s14, 4   ;;  %s518_s13 = smov %s520_s15 }
  0xa8   :  { %12 = sbr.rel (!%p10_p5) target bundleno = 2 (0x2), region = 62 }

// kernel: eve_forward.2
= control target key start
LH: loop header
LB: loop body
LE: loop exit
PB: predicated region body
PF: predicated region fallthrough
CT: control target
= control target key end

     0   :  { %s501_s12 = smov 0   ;;  %s503_s13 = smov 0   ;;  %s558_s0 = inlined_call_operand.vmem [shape: f32[2,8,128], index: 0, kind: input, shape index: {}]   ;;  %s559_s1 = inlined_call_operand.vmem [shape: f32[8,8], index: 1, kind: input, shape index: {}]   ;;  %s560_s2 = inlined_call_operand.vmem [shape: f32[2,8,1], index: 2, kind: output, shape index: {0}]   ;;  %s561_s3 = inlined_call_operand.vmem [shape: f32[2,8,1], index: 3, kind: output, shape index: {1}]  }
   0x1   :  { %s505_s14 = smov 0  }
   0x2 LB: > { %s26_s15 = sadd.s32 1, %s466_s13  ;;  %p400_p0 = scmp.ge.s32.totalorder %s470_s14, 1  ;;  %s470_s14 = sphi %s505_s14, %s14_s14   ;;  %s466_s13 = sphi %s503_s13, %s563_s13   ;;  %s462_s12 = sphi %s501_s12, %s562_s12  }
   0x3   : > { %p28_p1 = scmp.ge.s32.totalorder %s26_s15, 2  ;;  %p156_p2 = scmp.lt.s32.totalorder %s470_s14, 3 }
   0x5   : > { %s565_s15 = smov (%p28_p1, %s26_s15), 0  ;;  %p157_p3 = pnand %p400_p0, %p156_p2 }
   0x6   : > { %p185_p4 = scmp.lt.s32.totalorder (!%p157_p3), %s462_s12, 1 }
   0x7   : > { %160 = sbr.rel (%p157_p3) target bundleno = 305 (0x131), region = 28 }
   0xc   : > { %v207_v0 = vld [vmem:[%s559_s1] sm:$0xff]  ;;  %v472_v1 = vmov 2   ;;  %v473_v2 = vmov 0   ;;  %v474_v3 = vmov 3   ;;  %v475_v4 = vmov 1   ;;  %s567_s12 = smov (!%p185_p4, %s462_s12), 1 }
   0xd   : > { %441 = vset.pattern.permute.xlu1 %v472_v1  ;;  %439 = vset.pattern.permute.xlu0 %v473_v2  ;;  %v476_v5 = vmov 4   ;;  %v477_v6 = vmov 5   ;;  %v478_v7 = vmov 6   ;;  %v479_v8 = vmov 7   ;;  %s526_s18 = sshll.u32 %s567_s12, 3 }
   0xe   : > { %230 = vperm.xlu1 %441, %v207_v0   ;;  %211 = vperm.xlu0 %439, %v207_v0   ;;  %s532_s21 = scalar_lea.vmem %s560_s2, %s526_s18  ;;  %vm204_vm0 = vcmask 7168   ;;  %v480_v9 = vmov 0.0   ;;  %v214_v10 = vlaneseq  ;;  %s191_s24 = scalar_lea.vmem %s558_s0, %s526_s18 }
   0xf   : > { %205 = vst.msk [vmem:[%s532_s21] sm:$0xff] %vm204_vm0, %v480_v9  ;;  %v208_v17 = vld [vmem:[%s191_s24] sm:$0xff]  ;;  %s199_s27 = scalar_lea.vmem %s561_s3, %s526_s18 }
  0x10   : > { %v215_v11 = vshrl.u32 %v214_v10, 7  ;;  %206 = vst.msk [vmem:[%s199_s27] sm:$0xff] %vm204_vm0, %v480_v9 }
  0x12   : > { %442 = vset.pattern.permute.xlu1 %v474_v3  ;;  %440 = vset.pattern.permute.xlu0 %v475_v4  ;;  %v216_v12 = vsub.s32 0, %v215_v11  ;;  %v225_v13 = vsub.s32 1, %v215_v11  ;;  %v235_v14 = vsub.s32 2, %v215_v11  ;;  %v245_v19 = vsub.s32 3, %v215_v11 }
  0x13   : > { %240 = vperm.xlu1 %442, %v207_v0   ;;  %220 = vperm.xlu0 %440, %v207_v0   ;;  %v255_v21 = vsub.s32 4, %v215_v11  ;;  %v265_v25 = vsub.s32 5, %v215_v11  ;;  %v275_v33 = vsub.s32 6, %v215_v11  ;;  %v285_v42 = vsub.s32 7, %v215_v11 }
  0x14   : > { %v217_v18 = vrot.slane %v208_v17, %v216_v12  ;;  %v226_v20 = vrot.slane %v208_v17, %v225_v13  ;;  %v236_v22 = vrot.slane %v208_v17, %v235_v14  ;;  %v246_v27 = vrot.slane %v208_v17, %v245_v19 }
  0x15   : > { %v256_v29 = vrot.slane %v208_v17, %v255_v21  ;;  %v266_v32 = vrot.slane %v208_v17, %v265_v25  ;;  %v276_v41 = vrot.slane %v208_v17, %v275_v33  ;;  %v286_v47 = vrot.slane %v208_v17, %v285_v42 }
  0x16   : > { %v289_v53 = vld [vmem:[%s532_s21] sm:$0xff] }
  0x17   : > { %443 = vset.pattern.permute.xlu1 %v476_v5  ;;  %444 = vset.pattern.permute.xlu0 %v477_v6  ;;  %v295_v55 = vld [vmem:[%s199_s27] sm:$0xff] }
  0x18   : > { %250 = vperm.xlu1 %443, %v207_v0   ;;  %260 = vperm.xlu0 %444, %v207_v0  }
  0x1c   : > { %445 = vset.pattern.permute.xlu1 %v478_v7  ;;  %447 = vset.pattern.permute.xlu0 %v479_v8 }
  0x1d   : > { %270 = vperm.xlu1 %445, %v207_v0  }
  0x21   : > { %446 = vset.pattern.permute.xlu1 %v479_v8 }
  0x22   : > { %280 = vperm.xlu1 %446, %v207_v0  }
  0x89   : > { %v231_v15 = vpop.permute.xlu1 %230  ;;  %v212_v16 = vpop.permute.xlu0 %211 }
  0x8a   : > { %v218_v26 = vmul.f32 %v217_v18, %v212_v16  ;;  %v237_v30 = vmul.f32 %v236_v22, %v231_v15 }
  0x8e   : > { %v241_v23 = vpop.permute.xlu1 %240  ;;  %v221_v24 = vpop.permute.xlu0 %220 }
  0x8f   : > { %v227_v28 = vmul.f32 %v226_v20, %v221_v24  ;;  %v247_v34 = vmul.f32 %v246_v27, %v241_v23 }
  0x91   : > { %v228_v31 = vadd.f32 %v227_v28, %v218_v26 }
  0x93   : > { %v238_v35 = vadd.f32 %v237_v30, %v228_v31  ;;  %v251_v36 = vpop.permute.xlu1 %250  ;;  %v261_v37 = vpop.permute.xlu0 %260 }
  0x94   : > { %v257_v38 = vmul.f32 %v256_v29, %v251_v36  ;;  %v267_v40 = vmul.f32 %v266_v32, %v261_v37 }
  0x95   : > { %v248_v39 = vadd.f32 %v247_v34, %v238_v35 }
  0x97   : > { %v258_v43 = vadd.f32 %v257_v38, %v248_v39 }
  0x98   : > { %v271_v44 = vpop.permute.xlu1 %270 }
  0x99   : > { %v268_v45 = vadd.f32 %v267_v40, %v258_v43  ;;  %v277_v46 = vmul.f32 %v276_v41, %v271_v44 }
  0x9b   : > { %v278_v49 = vadd.f32 %v277_v46, %v268_v45 }
  0x9d   : > { %v281_v48 = vpop.permute.xlu1 %280 }
  0x9e   : > { %v287_v50 = vmul.f32 %v286_v47, %v281_v48 }
  0xa0   : > { %v288_v51 = vadd.f32 %v287_v50, %v278_v49 }
  0xa2   : > { %290 = vadd.xlane.f32.xlu0 %v288_v51  ;;  %v296_v52 = vmul.f32 %v288_v51, %v288_v51 }
  0xa4   : > { %297 = vadd.xlane.f32.xlu1 %v296_v52 }
 0x12b   : > { %v291_v54 = vpop.xlane.xlu0 %290 }
 0x12c   : > { %v292_v56 = vadd.f32 %v291_v54, %v289_v53 }
 0x12d   : > { %v298_v57 = vpop.xlane.xlu1 %297 }
 0x12e   : > { %294 = vst.msk [vmem:[%s532_s21] sm:$0xff] %vm204_vm0, %v292_v56  ;;  %v299_v58 = vadd.f32 %v298_v57, %v295_v55 }
 0x130   : > { %300 = vst.msk [vmem:[%s199_s27] sm:$0xff] %vm204_vm0, %v299_v58 }
 0x131 PF: > { %s14_s14 = sadd.s32 1, %s470_s14   ;;  %s562_s12 = smov %s466_s13 }
 0x132   : > { %p11_p5 = scmp.ge.s32.totalorder %s14_s14, 4   ;;  %s563_s13 = smov %s565_s15 }
 0x134   :  { %13 = sbr.rel (!%p11_p5) target bundleno = 2 (0x2), region = 74 }

</bundles_post_ra>
